<compile_context>
chip_gen: v6e
topology: v6e:2x2x1
jax: 0.10.0
libtpu: 0.0.40
codegen_flags: <defaults>
</compile_context>

<pallas_src>
import jax
import jax.numpy as jnp
from jax.experimental import pallas as pl
from jax.experimental.pallas import tpu as pltpu

_LANE = 128      # vreg lane width; batch maps to lanes
_MAX_TS = 1024   # max sublanes per tile -> 1024*128 samples (~2 MiB/step)


def _round_up(n, m):
    return ((n + m - 1) // m) * m


def _pick_ts(S):
    """Tile height (sublanes) for the [.., S, 128] layout.
    Must be a multiple of 8 or the full extent S (the (8,128) rule)."""
    if S <= 8:
        return S  # single full-extent block
    # aim for ~4 grid steps (pipeline overlap + both v7x TCs), cap tile size
    return min(_MAX_TS, _round_up(pl.cdiv(S, 4), 8))


def _binarynet_kernel(params_ref, x_ref, o_ref):
    """params_ref: SMEM f32[4] = [w0, w1, w2, b_eff] (fused affine scalars)
       x_ref:      VMEM f32[3, ts, 128]  (features on axis 0, batch on sublanes x lanes)
       o_ref:      VMEM f32[ts, 128]     (fully dense output tile)
    """
    # Fused affine map: 3 broadcast multiply-adds on the VPU.
    y = (params_ref[0] * x_ref[0]
         + params_ref[1] * x_ref[1]
         + params_ref[2] * x_ref[2]
         + params_ref[3])
    # sigmoid(y) == 0.5 * tanh(0.5*y) + 0.5 : one EUP op, numerically stable,
    # bounded even for garbage lanes in a ragged/padded tail block.
    o_ref[...] = (0.5 * jnp.tanh(0.5 * y) + 0.5).astype(o_ref.dtype)


@jax.jit
def binarynet_forward(x, w1, b1, w2, b2):
    """BinaryNet forward. Params use PyTorch layout:
       w1: [64, 3], b1: [64], w2: [1, 64], b2: [1]; x: [B, 3] -> out: [B, 1]."""
    B = x.shape[0]

    # --- exact algebraic fold of fc1/fc2 (no activation between them) ---
    w_eff = (w2 @ w1).reshape(3)          # [3]   = (W2 W1) row
    b_eff = (w2 @ b1 + b2).reshape(1)     # [1]
    params = jnp.concatenate([w_eff, b_eff]).astype(jnp.float32)  # SMEM f32[4]

    # --- sublane-dense layout: batch -> (S sublanes) x (128 lanes) ---
    b_pad = _round_up(B, _LANE)           # pad only to the lane width
    S = b_pad // _LANE
    x_t = jnp.pad(x.astype(jnp.float32).T, ((0, 0), (0, b_pad - B)))  # [3, b_pad]
    x_t = x_t.reshape(3, S, _LANE)                                    # [3, S, 128]

    ts = _pick_ts(S)
    grid = (pl.cdiv(S, ts),)              # ragged last tile allowed

    out = pl.pallas_call(
        _binarynet_kernel,
        out_shape=jax.ShapeDtypeStruct((S, _LANE), jnp.float32),
        grid=grid,
        in_specs=[
            pl.BlockSpec(memory_space=pltpu.MemorySpace.SMEM),        # fused scalars
            pl.BlockSpec((3, ts, _LANE), lambda i: (0, i, 0)),        # x tile
        ],
        out_specs=pl.BlockSpec((ts, _LANE), lambda i: (i, 0)),
        compiler_params=pltpu.CompilerParams(
            dimension_semantics=("parallel",),   # shard batch tiles across v7x's 2 TCs
        ),
    )(params, x_t)

    return out.reshape(b_pad)[:B].reshape(B, 1)


def init_params(key):
    """Deterministic init mimicking PyTorch nn.Linear defaults
    (uniform in +/- 1/sqrt(fan_in)), stored in PyTorch [out, in] layout."""
    k1, k2, k3, k4 = jax.random.split(key, 4)
    bound1 = 1.0 / jnp.sqrt(3.0)
    bound2 = 1.0 / jnp.sqrt(64.0)
    w1 = jax.random.uniform(k1, (64, 3), jnp.float32, -bound1, bound1)
    b1 = jax.random.uniform(k2, (64,), jnp.float32, -bound1, bound1)
    w2 = jax.random.uniform(k3, (1, 64), jnp.float32, -bound2, bound2)
    b2 = jax.random.uniform(k4, (1,), jnp.float32, -bound2, bound2)
    return w1, b1, w2, b2


if __name__ == "__main__":
    key = jax.random.PRNGKey(0)
    kx, kp = jax.random.split(key)
    w1, b1, w2, b2 = init_params(kp)

    # small smoke test (B not a multiple of 128 -> exercises lane padding)
    B = 8
    x = jax.random.normal(kx, (B, 3), jnp.float32)
    out = jax.block_until_ready(binarynet_forward(x, w1, b1, w2, b2))
    ref = jax.nn.sigmoid((x @ w1.T + b1) @ w2.T + b2)   # PyTorch forward, in JAX
    assert out.shape == (B, 1)
    assert jnp.allclose(out, ref, atol=1e-5, rtol=1e-5)

    # second shape: multi-step grid with a ragged last tile (S=17, ts=8, grid=3)
    B2 = 2100
    x2 = jax.random.normal(kx, (B2, 3), jnp.float32)
    out2 = jax.block_until_ready(binarynet_forward(x2, w1, b1, w2, b2))
    ref2 = jax.nn.sigmoid((x2 @ w1.T + b1) @ w2.T + b2)
    assert out2.shape == (B2, 1)
    assert jnp.allclose(out2, ref2, atol=1e-5, rtol=1e-5)

    print("KERNEL_OK")
</pallas_src>

<mosaic_0001>
module attributes {stable_mosaic.version = 11 : i64} {
  func.func @_binarynet_kernel(%arg0: i32, %arg1: memref<4xf32, #tpu.memory_space<smem>>, %arg2: memref<3x1x128xf32, #tpu.memory_space<vmem>>, %arg3: memref<1x128xf32, #tpu.memory_space<vmem>>) attributes {dimension_semantics = [#tpu.dimension_semantics<parallel>], iteration_bounds = array<i64: 1>, scalar_prefetch = 0 : i64, scratch_operands = 0 : i64, tpu.core_type = #tpu.core_type<tc>, window_params = [{transform_indices = @transform_0, window_bounds = array<i64: 4>}, {transform_indices = @transform_1, window_bounds = array<i64: 3, 1, 128>}, {transform_indices = @transform_2, window_bounds = array<i64: 1, 128>}]} {
    %c0 = arith.constant 0 : index
    %0 = memref.load %arg1[%c0] : memref<4xf32, #tpu.memory_space<smem>>
    %c0_0 = arith.constant 0 : index
    %c0_1 = arith.constant 0 : index
    %c0_2 = arith.constant 0 : index
    %1 = vector.load %arg2[%c0_0, %c0_1, %c0_2] : memref<3x1x128xf32, #tpu.memory_space<vmem>>, vector<1x1x128xf32>
    %2 = vector.shape_cast %1 : vector<1x1x128xf32> to vector<1x128xf32>
    %3 = vector.broadcast %0 : f32 to vector<1x128xf32>
    %4 = arith.mulf %3, %2 : vector<1x128xf32>
    %c1 = arith.constant 1 : index
    %5 = memref.load %arg1[%c1] : memref<4xf32, #tpu.memory_space<smem>>
    %c1_3 = arith.constant 1 : index
    %c0_4 = arith.constant 0 : index
    %c0_5 = arith.constant 0 : index
    %6 = vector.load %arg2[%c1_3, %c0_4, %c0_5] : memref<3x1x128xf32, #tpu.memory_space<vmem>>, vector<1x1x128xf32>
    %7 = vector.shape_cast %6 : vector<1x1x128xf32> to vector<1x128xf32>
    %8 = vector.broadcast %5 : f32 to vector<1x128xf32>
    %9 = arith.mulf %8, %7 : vector<1x128xf32>
    %10 = arith.addf %4, %9 : vector<1x128xf32>
    %c2 = arith.constant 2 : index
    %11 = memref.load %arg1[%c2] : memref<4xf32, #tpu.memory_space<smem>>
    %c2_6 = arith.constant 2 : index
    %c0_7 = arith.constant 0 : index
    %c0_8 = arith.constant 0 : index
    %12 = vector.load %arg2[%c2_6, %c0_7, %c0_8] : memref<3x1x128xf32, #tpu.memory_space<vmem>>, vector<1x1x128xf32>
    %13 = vector.shape_cast %12 : vector<1x1x128xf32> to vector<1x128xf32>
    %14 = vector.broadcast %11 : f32 to vector<1x128xf32>
    %15 = arith.mulf %14, %13 : vector<1x128xf32>
    %16 = arith.addf %10, %15 : vector<1x128xf32>
    %c3 = arith.constant 3 : index
    %17 = memref.load %arg1[%c3] : memref<4xf32, #tpu.memory_space<smem>>
    %18 = vector.broadcast %17 : f32 to vector<1x128xf32>
    %19 = arith.addf %16, %18 : vector<1x128xf32>
    %cst = arith.constant 5.000000e-01 : f32
    %20 = vector.broadcast %cst : f32 to vector<1x128xf32>
    %21 = arith.mulf %20, %19 : vector<1x128xf32>
    %22 = math.tanh %21 : vector<1x128xf32>
    %cst_9 = arith.constant 5.000000e-01 : f32
    %23 = vector.broadcast %cst_9 : f32 to vector<1x128xf32>
    %24 = arith.mulf %23, %22 : vector<1x128xf32>
    %cst_10 = arith.constant 5.000000e-01 : f32
    %25 = vector.broadcast %cst_10 : f32 to vector<1x128xf32>
    %26 = arith.addf %24, %25 : vector<1x128xf32>
    %c0_11 = arith.constant 0 : index
    %c0_12 = arith.constant 0 : index
    %27 = vector.load %arg3[%c0_11, %c0_12] : memref<1x128xf32, #tpu.memory_space<vmem>>, vector<1x128xf32>
    tpu.vector_store %arg3[%c0_11, %c0_12], %26 {strides = array<i32>} : memref<1x128xf32, #tpu.memory_space<vmem>>, vector<1x128xf32>,
    return
  }
  func.func @transform_0(%arg0: i32) -> i32 {
    %c0_i32 = arith.constant 0 : i32
    %c0_i32_0 = arith.constant 0 : i32
    return %c0_i32 : i32
  }
  func.func @transform_1(%arg0: i32) -> (i32, i32, i32) {
    %c0_i32 = arith.constant 0 : i32
    %c0_i32_0 = arith.constant 0 : i32
    %c0_i32_1 = arith.constant 0 : i32
    return %c0_i32, %arg0, %c0_i32_0 : i32, i32, i32
  }
  func.func @transform_2(%arg0: i32) -> (i32, i32) {
    %c0_i32 = arith.constant 0 : i32
    %c0_i32_0 = arith.constant 0 : i32
    return %arg0, %c0_i32 : i32, i32
  }
}

</mosaic_0001>

<bundles_post_ra>
// kernel: binarynet_forward.1
= control target key start
LH: loop header
LB: loop body
LE: loop exit
PB: predicated region body
PF: predicated region fallthrough
CT: control target
= control target key end

     0   :  { %7 = vsyncpa [#allocation3], 0  ;;  %s106_s0 = inlined_call_operand.vmem [shape: f32[4], index: 0, kind: input, shape index: {}]   ;;  %s107_s1 = inlined_call_operand.vmem [shape: f32[3,1,128], index: 1, kind: input, shape index: {}]   ;;  %s108_s2 = inlined_call_operand.vmem [shape: f32[1,128], index: 2, kind: output, shape index: {}]  }
   0x1   :  { %s14_s11 = sshll.u32 %s106_s0, 4  ;;  %s15_s11 = int_to_ptr.vmem [resolvable:$true] %s14_s11 }
   0x2   :  { %s61_s12 = scalar_lea.vmem %s15_s11, 16  ;;  %p66_p1 = scmp.lt.s32.totalorder %s15_s11, %s15_s11 }
   0x3   :  { %p62_p0 = scmp.ne.s32.totalorder %s15_s11, %s61_s12  ;;  %p67_p2 = scmp.lt.s32.totalorder %s61_s12, %s61_s12 }
   0x5   :  { %p68_p3 = por %p67_p2, %p66_p1 }
   0x7   :  { %p69_p4 = pnand %p68_p3, %p62_p0 }
   0x9   :  { %72 = shalt.err (!%p69_p4)
}
   0xa   :  { %s75_s13 = smov [#allocation2]  }
   0xb   :  { %17 = dma.vmem_to_smem %s15_s11, 16, %s75_s13, [#allocation3]  }
   0xc   :  { %73 = dma.done.wait [#allocation3], 16  }
   0xd   :  { %74 = vsyncadd [#allocation3], 4294967280 }
   0xe   :  { %23 = sfence }
   0xf   :  { %s24_s14 = sld [smem:[#allocation2]]  ;;  %v25_v0 = vld [vmem:[%s107_s1] sm:$0x1]  ;;  %v54_v1 = vld [vmem:[%s107_s1 + $0x1] sm:$0x1] }
  0x10   :  { %s53_s15 = sld [smem:[#allocation2 + $0x1]]  ;;  %v56_v3 = vld [vmem:[%s107_s1 + $0x2] sm:$0x1] }
  0x11   :  { %s55_s16 = sld [smem:[#allocation2 + $0x2]] }
  0x12   :  { %s57_s17 = sld [smem:[#allocation2 + $0x3]] }
  0x15   :  { %v26_v2 = vstv %s24_s14 }
  0x16   :  { %v27_v4 = vmul.f32 %v26_v2, %v25_v0  ;;  %v31_v5 = vstv %s53_s15 }
  0x17   :  { %v32_v6 = vmul.f32 %v54_v1, %v31_v5  ;;  %v37_v7 = vstv %s55_s16 }
  0x18   :  { %v38_v8 = vmul.f32 %v56_v3, %v37_v7  ;;  %v41_v10 = vstv %s57_s17 }
  0x19   :  { %v33_v9 = vadd.f32 %v32_v6, %v27_v4 }
  0x1b   :  { %v39_v11 = vadd.f32 %v38_v8, %v33_v9 }
  0x1d   :  { %v42_v12 = vadd.f32 %v41_v10, %v39_v11 }
  0x1f   :  { %v43_v13 = vmul.f32 0.5, %v42_v12 }
  0x21   :  { %59 = vtanh.f32 %v43_v13 }
  0x2e   :  { %v60_v14 = vpop.eup %59 }
  0x2f   :  { %v45_v15 = vmul.f32 0.5, %v60_v14 }
  0x31   :  { %v46_v16 = vadd.f32 0.5, %v45_v15 }
  0x33   :  { %47 = vst [vmem:[%s108_s2] sm:$0x1] %v46_v16 }
  0x34   :  { %52 = vsyncpa [#allocation3], 1 }

</bundles_post_ra>
